<compile_context>
chip_gen: v5e
topology: v5e:2x2
jax: 0.10.0
libtpu: 0.0.40
codegen_flags: <defaults>
</compile_context>

<pallas_src>
import math

import jax
import jax.numpy as jnp
from jax.experimental import pallas as pl
from jax.experimental.pallas import tpu as pltpu

_LANES = 128
_SUBLANES = 8
_TARGET_BLOCK_BYTES = 4 * 1024 * 1024   # ~4 MiB per x block
_MAX_TN = 4096                          # lane-tile cap for very wide H


def _round_up(a, b):
    return ((a + b - 1) // b) * b


def _dyt_kernel(alpha_ref, x_ref, w_ref, b_ref, o_ref):
    # alpha_ref: SMEM (1,1) scalar; x_ref: (tm, TN); w_ref/b_ref: (1, TN)
    a = alpha_ref[0, 0]
    x = x_ref[...].astype(jnp.float32)
    y = jnp.tanh(x * a)                                   # EUP slot
    o_ref[...] = (y * w_ref[...].astype(jnp.float32)      # VPU FMA
                  + b_ref[...].astype(jnp.float32)).astype(o_ref.dtype)


def dynamic_tanh(x, alpha, weight, bias):
    """y = addcmul(bias, tanh(alpha * x), weight), broadcasting over trailing dim."""
    orig_shape = x.shape
    H = weight.shape[-1]
    assert orig_shape[-1] == H, "last axis of x must equal the affine dim"

    x2 = x.reshape(-1, H)
    M = x2.shape[0]
    itemsize = jnp.dtype(x.dtype).itemsize

    # ---- lane-dense packing: fold k rows/lane-row so packed dim Hp % 128 == 0.
    k = _LANES // math.gcd(H, _LANES)
    Hp = k * H

    # ---- lane tile: split very wide Hp so per-block VMEM stays bounded.
    if Hp <= _MAX_TN:
        TN = Hp
    else:
        TN = _LANES
        for t in range(_MAX_TN, _LANES - 1, -_LANES):
            if Hp % t == 0:
                TN = t
                break

    # ---- row tile: biggest multiple of 8 keeping the x block near the target.
    tm_cap = max(_SUBLANES,
                 (_TARGET_BLOCK_BYTES // (TN * itemsize)) // _SUBLANES * _SUBLANES)
    mp_min = _round_up(pl.cdiv(M, k), _SUBLANES)
    tm = min(tm_cap, mp_min)

    # ---- pad rows so the packed slab tiles exactly (padded rows discarded later).
    M_padded = _round_up(M, k * tm)
    if M_padded > M:
        x2 = jnp.pad(x2, ((0, M_padded - M), (0, 0)))
    Mp = M_padded // k
    xp = x2.reshape(Mp, Hp)

    alpha2 = jnp.asarray(alpha, dtype=jnp.float32).reshape(1, 1)
    w_p = jnp.tile(weight.reshape(-1), k).reshape(1, Hp)
    b_p = jnp.tile(bias.reshape(-1), k).reshape(1, Hp)

    grid = (Mp // tm, Hp // TN)

    cost = pl.CostEstimate(
        flops=3 * M * H,
        transcendentals=M * H,
        bytes_accessed=2 * M * H * itemsize + 2 * H * jnp.dtype(weight.dtype).itemsize,
    )

    outp = pl.pallas_call(
        _dyt_kernel,
        out_shape=jax.ShapeDtypeStruct((Mp, Hp), x.dtype),
        grid_spec=pltpu.PrefetchScalarGridSpec(
            num_scalar_prefetch=0,
            grid=grid,
            in_specs=[
                pl.BlockSpec(memory_space=pltpu.SMEM),         # alpha scalar
                pl.BlockSpec((tm, TN), lambda i, j: (i, j)),   # x rows
                pl.BlockSpec((1, TN), lambda i, j: (0, j)),    # weight (resident over i)
                pl.BlockSpec((1, TN), lambda i, j: (0, j)),    # bias   (resident over i)
            ],
            out_specs=pl.BlockSpec((tm, TN), lambda i, j: (i, j)),
        ),
        compiler_params=pltpu.CompilerParams(
            dimension_semantics=("parallel", "parallel"),
            vmem_limit_bytes=32 * 1024 * 1024,
        ),
        cost_estimate=cost,
    )(alpha2, xp, w_p, b_p)

    out2 = outp.reshape(M_padded, H)[:M]
    return out2.reshape(orig_shape)


if __name__ == "__main__":
    key = jax.random.PRNGKey(0)

    batch, seq, hidden = 2, 8, 32
    init_alpha = 0.5

    # Deterministic "parameter init" matching nn.Module.__init__:
    #   alpha = ones(1) * init_alpha, weight = ones(dim), bias = zeros(dim)
    # (perturb weight/bias slightly so the affine path is actually exercised)
    alpha = jnp.ones((1,), dtype=jnp.float32) * init_alpha
    kw, kb, kx = jax.random.split(key, 3)
    weight = jnp.ones((hidden,), dtype=jnp.float32) + 0.01 * jax.random.normal(kw, (hidden,))
    bias = jnp.zeros((hidden,), dtype=jnp.float32) + 0.01 * jax.random.normal(kb, (hidden,))

    x = jax.random.normal(kx, (batch, seq, hidden), dtype=jnp.float32)

    out = dynamic_tanh(x, alpha, weight, bias)
    out = jax.block_until_ready(out)

    # Reference check (pure JAX)
    ref = jnp.tanh(x * alpha[0]) * weight + bias
    assert out.shape == x.shape and out.dtype == x.dtype
    assert jnp.allclose(out, ref, atol=1e-6, rtol=1e-6), "mismatch vs reference"

    print("KERNEL_OK")
</pallas_src>

<mosaic_0001>
module attributes {stable_mosaic.version = 11 : i64} {
  func.func @_dyt_kernel(%arg0: i32, %arg1: i32, %arg2: memref<1x1xf32, #tpu.memory_space<smem>>, %arg3: memref<8x128xf32, #tpu.memory_space<vmem>>, %arg4: memref<1x128xf32, #tpu.memory_space<vmem>>, %arg5: memref<1x128xf32, #tpu.memory_space<vmem>>, %arg6: memref<8x128xf32, #tpu.memory_space<vmem>>) attributes {dimension_semantics = [#tpu.dimension_semantics<parallel>, #tpu.dimension_semantics<parallel>], iteration_bounds = array<i64: 1, 1>, scalar_prefetch = 0 : i64, scratch_operands = 0 : i64, tpu.core_type = #tpu.core_type<tc>, window_params = [{transform_indices = @transform_0, window_bounds = array<i64: 1, 1>}, {transform_indices = @transform_1, window_bounds = array<i64: 8, 128>}, {transform_indices = @transform_2, window_bounds = array<i64: 1, 128>}, {transform_indices = @transform_3, window_bounds = array<i64: 1, 128>}, {transform_indices = @transform_4, window_bounds = array<i64: 8, 128>}]} {
    %c0 = arith.constant 0 : index
    %c0_0 = arith.constant 0 : index
    %0 = memref.load %arg2[%c0, %c0_0] : memref<1x1xf32, #tpu.memory_space<smem>>
    %c0_1 = arith.constant 0 : index
    %c0_2 = arith.constant 0 : index
    %1 = vector.load %arg3[%c0_1, %c0_2] : memref<8x128xf32, #tpu.memory_space<vmem>>, vector<8x128xf32>
    %2 = vector.broadcast %0 : f32 to vector<8x128xf32>
    %3 = arith.mulf %1, %2 : vector<8x128xf32>
    %4 = math.tanh %3 : vector<8x128xf32>
    %c0_3 = arith.constant 0 : index
    %c0_4 = arith.constant 0 : index
    %5 = vector.load %arg4[%c0_3, %c0_4] : memref<1x128xf32, #tpu.memory_space<vmem>>, vector<1x128xf32>
    %6 = vector.broadcast %5 : vector<1x128xf32> to vector<8x128xf32>
    %7 = arith.mulf %4, %6 : vector<8x128xf32>
    %c0_5 = arith.constant 0 : index
    %c0_6 = arith.constant 0 : index
    %8 = vector.load %arg5[%c0_5, %c0_6] : memref<1x128xf32, #tpu.memory_space<vmem>>, vector<1x128xf32>
    %9 = vector.broadcast %8 : vector<1x128xf32> to vector<8x128xf32>
    %10 = arith.addf %7, %9 : vector<8x128xf32>
    %c0_7 = arith.constant 0 : index
    %c0_8 = arith.constant 0 : index
    %11 = vector.load %arg6[%c0_7, %c0_8] : memref<8x128xf32, #tpu.memory_space<vmem>>, vector<8x128xf32>
    tpu.vector_store %arg6[%c0_7, %c0_8], %10 {strides = array<i32>} : memref<8x128xf32, #tpu.memory_space<vmem>>, vector<8x128xf32>,
    return
  }
  func.func @transform_0(%arg0: i32, %arg1: i32) -> (i32, i32) {
    %c0_i32 = arith.constant 0 : i32
    %c0_i32_0 = arith.constant 0 : i32
    %c0_i32_1 = arith.constant 0 : i32
    return %c0_i32, %c0_i32_0 : i32, i32
  }
  func.func @transform_1(%arg0: i32, %arg1: i32) -> (i32, i32) {
    %c0_i32 = arith.constant 0 : i32
    return %arg0, %arg1 : i32, i32
  }
  func.func @transform_2(%arg0: i32, %arg1: i32) -> (i32, i32) {
    %c0_i32 = arith.constant 0 : i32
    %c0_i32_0 = arith.constant 0 : i32
    return %c0_i32, %arg1 : i32, i32
  }
  func.func @transform_3(%arg0: i32, %arg1: i32) -> (i32, i32) {
    %c0_i32 = arith.constant 0 : i32
    %c0_i32_0 = arith.constant 0 : i32
    return %c0_i32, %arg1 : i32, i32
  }
  func.func @transform_4(%arg0: i32, %arg1: i32) -> (i32, i32) {
    %c0_i32 = arith.constant 0 : i32
    return %arg0, %arg1 : i32, i32
  }
}

</mosaic_0001>

<bundles_post_ra>
// kernel: tpu_custom_call.1
= control target key start
LH: loop header
LB: loop body
LE: loop exit
PB: predicated region body
PF: predicated region fallthrough
CT: control target
= control target key end

     0   :  { %10 = vsyncpa [#allocation4], 0  ;;  %s166_s0 = inlined_call_operand.<no memory space> [shape: f32[1,1], index: 0, kind: input, shape index: {}]   ;;  %s167_s1 = inlined_call_operand.hbm [shape: f32[8,128], index: 1, kind: input, shape index: {}]   ;;  %s168_s2 = inlined_call_operand.vmem [shape: f32[1,128], index: 2, kind: input, shape index: {}]   ;;  %s169_s3 = inlined_call_operand.vmem [shape: f32[1,128], index: 3, kind: input, shape index: {}]   ;;  %s170_s4 = inlined_call_operand.hbm [shape: f32[8,128], index: 4, kind: output, shape index: {}]  }
   0x1   :  { %11 = vsyncpa [#allocation5], 0  ;;  %s19_s17 = sshll.u32 %s167_s1, 4  ;;  %s124_s18 = smov [#allocation3]   ;;  %s20_s17 = int_to_ptr.hbm [resolvable:$true] %s19_s17 }
   0x2   :  { %s21_s19 = sshll.u32 %s124_s18, 4  ;;  %s22_s19 = int_to_ptr.vmem [resolvable:$true] %s21_s19 }
   0x3   :  { %24 = dma.hbm_to_vmem [thread:$0]  %s20_s17, 128, %s22_s19, [#allocation4]  }
   0x4   :  { %120 = dma.done.wait [#allocation4], 128  }
   0x5   :  { %121 = vsyncadd [#allocation4], 4294967168  ;;  %v35_v0 = vstv %s166_s0  ;;  %v34_v1 = vld [vmem:[#allocation3] sm:$0xff]  ;;  %s125_s25 = smov [#allocation6]   ;;  %s56_s29 = sshll.u32 %s170_s4, 4  ;;  %s57_s29 = int_to_ptr.hbm [resolvable:$true] %s56_s29 }
   0x6   :  { %v36_v2 = vmul.f32 %v35_v0, %v34_v1  ;;  %v68_v3 = vld [vmem:[%s168_s2] ss:$0 sm:$0xff]  ;;  %s54_s26 = sshll.u32 %s125_s25, 4  ;;  %s55_s26 = int_to_ptr.vmem [resolvable:$true] %s54_s26 }
   0x7   :  { %v69_v4 = vld [vmem:[%s169_s3] ss:$0 sm:$0xff] }
   0x8   :  { %70 = vtanh.f32 %v36_v2 }
   0xe   :  { %v71_v5 = vpop.eup %70 }
   0xf   :  { %v42_v6 = vmul.f32 %v71_v5, %v68_v3 }
  0x11   :  { %v47_v7 = vadd.f32 %v69_v4, %v42_v6 }
  0x13   :  { %48 = vst [vmem:[#allocation6] sm:$0xff] %v47_v7 }
  0x14   :  { %59 = dma.vmem_to_hbm [thread:$0]  %s55_s26, 128, %s57_s29, [#allocation5]  }
  0x15   :  { %122 = dma.done.wait [#allocation5], 128  }
  0x16   :  { %123 = vsyncadd [#allocation5], 4294967168 }
  0x17   :  { %64 = vsyncpa [#allocation4], 1 }
  0x18   :  { %65 = vsyncpa [#allocation5], 1 }

</bundles_post_ra>
